<compile_context>
chip_gen: v6e
topology: v6e:2x2x1
jax: 0.10.0
libtpu: 0.0.40
codegen_flags: <defaults>
</compile_context>

<pallas_src>
import functools
import math

import jax
import jax.numpy as jnp
from jax.experimental import pallas as pl
from jax.experimental.pallas import tpu as pltpu

GN_GROUPS = 16
GN_EPS = 1e-6


def _round_up(x, m):
    return ((x + m - 1) // m) * m


def _sublane_multiple(dtype):
    # f32 -> 8, bf16 -> 16, int8/fp8 -> 32 sublanes per packed tile.
    return max(8, 32 // jnp.dtype(dtype).itemsize)


def _tpu_vmem_bytes():
    try:
        info = pltpu.get_tpu_info()
        for attr in ("vmem_capacity_bytes", "vmem_size_bytes", "vmem_bytes"):
            v = getattr(info, attr, None)
            if v:
                return int(v)
    except Exception:
        pass
    return 128 << 20


def _budgets():
    vmem = _tpu_vmem_bytes()
    big = vmem >= (96 << 20)                      # v5e / v6e (128 MiB) vs v7x (64 MiB)
    vmem_limit = min((vmem * 3) // 4, 96 << 20)   # 96 MiB on v5e/v6e, 48 MiB on v7x
    fused_cap = (8 << 20) if big else (4 << 20)   # per-block cap, fused single pass
    tiled_cap = (4 << 20) if big else (2 << 20)   # per-block cap, two-pass tiles
    return fused_cap, tiled_cap, vmem_limit


# ---------------------------------------------------------------------------
# Kernels
# ---------------------------------------------------------------------------
def _gn_fused_kernel(x_ref, gamma_ref, beta_ref, o_ref, *, inv_count, eps):
    """One sample per grid point; all groups resident. x block: (1, G, cpg, S)."""
    x = x_ref[0].astype(jnp.float32)                  # (G, cpg, S), spatial on lanes
    ps = jnp.sum(x, axis=2, keepdims=True)            # (G, cpg, 1) per-channel sums
    pq = jnp.sum(x * x, axis=2, keepdims=True)        # (G, cpg, 1)
    s1 = jnp.sum(ps, axis=1, keepdims=True)           # (G, 1, 1) group sums
    s2 = jnp.sum(pq, axis=1, keepdims=True)
    mean = s1 * inv_count
    var = jnp.maximum(s2 * inv_count - mean * mean, 0.0)
    rstd = jax.lax.rsqrt(var + eps)
    scale = gamma_ref[...].astype(jnp.float32) * rstd        # (G, cpg, 1)
    shift = beta_ref[...].astype(jnp.float32) - mean * scale
    o_ref[0] = (x * scale + shift).astype(o_ref.dtype)


def _gn_stats_kernel(x_ref, sum_ref, sq_ref, *, ts, true_s):
    """Pass 1: accumulate per-channel sum / sum-of-squares over spatial tiles.

    x block: (1, C, ts); outputs (1, C, 1) stay resident across the spatial axis.
    """
    s_idx = pl.program_id(1)

    @pl.when(s_idx == 0)
    def _():
        sum_ref[...] = jnp.zeros_like(sum_ref)
        sq_ref[...] = jnp.zeros_like(sq_ref)

    x = x_ref[0].astype(jnp.float32)                  # (C, ts)
    if true_s % ts != 0:
        # Ragged last tile: out-of-bounds block contents are unspecified -> mask
        # BEFORE the reductions (true element count handled via inv_count).
        col = s_idx * ts + jax.lax.broadcasted_iota(jnp.int32, x.shape, 1)
        x = jnp.where(col < true_s, x, 0.0)
    sum_ref[0] += jnp.sum(x, axis=1, keepdims=True)   # (C, 1)
    sq_ref[0] += jnp.sum(x * x, axis=1, keepdims=True)


def _gn_apply_kernel(x_ref, scale_ref, shift_ref, o_ref):
    """Pass 2: lane-dense fused multiply-add normalize (OOB writes are dropped)."""
    x = x_ref[0].astype(jnp.float32)                  # (C, ts)
    o_ref[0] = (x * scale_ref[0] + shift_ref[0]).astype(o_ref.dtype)


# ---------------------------------------------------------------------------
# Wrapper
# ---------------------------------------------------------------------------
def group_norm(x, gamma, beta, *, num_groups=GN_GROUPS, eps=GN_EPS, tile_s=None):
    """GroupNorm forward matching torch.nn.GroupNorm(num_groups, C, eps, affine=True).

    x: (N, C, *spatial); gamma, beta: (C,). tile_s forces the tiled two-pass path.
    """
    N, C = x.shape[0], x.shape[1]
    if C % num_groups != 0:
        raise ValueError(f"C={C} not divisible by num_groups={num_groups}")
    G = num_groups
    cpg = C // G
    spatial = x.shape[2:]
    S = int(math.prod(spatial)) if spatial else 1
    out_dtype = x.dtype
    itemsize = jnp.dtype(x.dtype).itemsize
    sub = _sublane_multiple(x.dtype)
    inv_count = 1.0 / float(cpg * S)

    fused_cap, tiled_cap, vmem_limit = _budgets()

    # Padded VMEM footprint of one fused per-sample block (sublane + lane padding).
    fused_block_bytes = G * _round_up(cpg, sub) * _round_up(S, 128) * itemsize
    use_fused = (tile_s is None) and (fused_block_bytes <= fused_cap)

    if use_fused:
        # Single pass: read x once, write y once. No wrapper pad -- the block's
        # last two dims equal the full array dims, which is always legal.
        xg = x.reshape(N, G, cpg, S)                  # free reshape, no transpose
        gk = gamma.reshape(G, cpg, 1).astype(jnp.float32)
        bk = beta.reshape(G, cpg, 1).astype(jnp.float32)
        kern = functools.partial(_gn_fused_kernel, inv_count=inv_count, eps=eps)
        y = pl.pallas_call(
            kern,
            out_shape=jax.ShapeDtypeStruct((N, G, cpg, S), out_dtype),
            grid=(N,),
            in_specs=[
                pl.BlockSpec((1, G, cpg, S), lambda n: (n, 0, 0, 0)),
                pl.BlockSpec((G, cpg, 1), lambda n: (0, 0, 0)),
                pl.BlockSpec((G, cpg, 1), lambda n: (0, 0, 0)),
            ],
            out_specs=pl.BlockSpec((1, G, cpg, S), lambda n: (n, 0, 0, 0)),
            compiler_params=pltpu.CompilerParams(
                dimension_semantics=("parallel",),
                vmem_limit_bytes=vmem_limit),
        )(xg, gk, bk)
        return y.reshape(x.shape)

    # ------------------------------------------------------------------
    # Tiled two-pass path: full-C (sublane-dense) blocks, spatial tiles on lanes.
    # ------------------------------------------------------------------
    xc = x.reshape(N, C, S)                           # native layout, free reshape
    if tile_s is not None:
        ts = max(128, _round_up(int(tile_s), 128))
    else:
        ts = (tiled_cap // (C * itemsize)) // 128 * 128
        ts = max(512, min(ts, 64 * 1024))
    ts = min(ts, _round_up(S, 128))
    num_t = pl.cdiv(S, ts)

    stats_kern = functools.partial(_gn_stats_kernel, ts=ts, true_s=S)
    sums, sqs = pl.pallas_call(
        stats_kern,
        out_shape=(jax.ShapeDtypeStruct((N, C, 1), jnp.float32),
                   jax.ShapeDtypeStruct((N, C, 1), jnp.float32)),
        grid=(N, num_t),
        in_specs=[pl.BlockSpec((1, C, ts), lambda n, s: (n, 0, s))],
        out_specs=(pl.BlockSpec((1, C, 1), lambda n, s: (n, 0, 0)),
                   pl.BlockSpec((1, C, 1), lambda n, s: (n, 0, 0))),
        compiler_params=pltpu.CompilerParams(
            dimension_semantics=("parallel", "arbitrary"),
            vmem_limit_bytes=vmem_limit),
    )(xc)

    # Tiny (N, C) group reduction + affine fold in plain JAX (negligible traffic).
    gs1 = jnp.sum(sums.reshape(N, G, cpg), axis=2, keepdims=True)   # (N, G, 1)
    gs2 = jnp.sum(sqs.reshape(N, G, cpg), axis=2, keepdims=True)
    mean = gs1 * inv_count
    var = jnp.maximum(gs2 * inv_count - mean * mean, 0.0)
    rstd = jax.lax.rsqrt(var + eps)
    gflat = gamma.reshape(1, G, cpg).astype(jnp.float32)
    bflat = beta.reshape(1, G, cpg).astype(jnp.float32)
    scale = (gflat * rstd).reshape(N, C, 1)
    shift = (bflat - mean * gflat * rstd).reshape(N, C, 1)

    y = pl.pallas_call(
        _gn_apply_kernel,
        out_shape=jax.ShapeDtypeStruct((N, C, S), out_dtype),
        grid=(N, num_t),
        in_specs=[
            pl.BlockSpec((1, C, ts), lambda n, s: (n, 0, s)),
            pl.BlockSpec((1, C, 1), lambda n, s: (n, 0, 0)),
            pl.BlockSpec((1, C, 1), lambda n, s: (n, 0, 0)),
        ],
        out_specs=pl.BlockSpec((1, C, ts), lambda n, s: (n, 0, s)),
        compiler_params=pltpu.CompilerParams(
            dimension_semantics=("parallel", "parallel"),
            vmem_limit_bytes=vmem_limit),
    )(xc, scale, shift)
    return y.reshape(x.shape)


class GroupNormModule:
    """Mirror of the reference PyTorch module (16 groups, eps=1e-6, affine init 1/0)."""

    def __init__(self, channels):
        self.gamma = jnp.ones((channels,), jnp.float32)
        self.beta = jnp.zeros((channels,), jnp.float32)

    def __call__(self, x, **kwargs):
        return group_norm(x, self.gamma, self.beta, **kwargs)


# ---------------------------------------------------------------------------
# Reference + test
# ---------------------------------------------------------------------------
def group_norm_ref(x, gamma, beta, num_groups=GN_GROUPS, eps=GN_EPS):
    N, C = x.shape[0], x.shape[1]
    xs = x.reshape(N, num_groups, -1).astype(jnp.float32)
    mean = jnp.mean(xs, axis=2, keepdims=True)
    var = jnp.mean(jnp.square(xs - mean), axis=2, keepdims=True)
    y = ((xs - mean) * jax.lax.rsqrt(var + eps)).reshape(x.shape)
    bshape = (1, C) + (1,) * (x.ndim - 2)
    return (y * gamma.reshape(bshape) + beta.reshape(bshape)).astype(x.dtype)


def _check(name, got, want, atol=1e-4, rtol=1e-4):
    got = jax.block_until_ready(got)
    ok = bool(jnp.allclose(got, want, atol=atol, rtol=rtol))
    err = float(jnp.max(jnp.abs(got.astype(jnp.float32) - want.astype(jnp.float32))))
    assert ok, f"{name}: max abs err {err}"


if __name__ == "__main__":
    key = jax.random.PRNGKey(0)
    k1, k2, k3, k4 = jax.random.split(key, 4)

    # Case 1: C=64 (cpg=4), spatial 16x16 -> S=256 (lane aligned).
    x1 = jax.random.normal(k1, (2, 64, 16, 16), jnp.float32)
    gamma1 = 1.0 + 0.2 * jax.random.normal(k2, (64,), jnp.float32)
    beta1 = 0.1 * jax.random.normal(k3, (64,), jnp.float32)
    ref1 = group_norm_ref(x1, gamma1, beta1)

    gn_auto = jax.jit(group_norm)                                   # auto -> fused path
    gn_tiled = jax.jit(functools.partial(group_norm, tile_s=128))   # force tiled two-pass

    _check("fused C=64", gn_auto(x1, gamma1, beta1), ref1)
    _check("tiled C=64", gn_tiled(x1, gamma1, beta1), ref1)

    # Case 2: unaligned spatial (S=210 -> lane padding / ragged tile), C=32 (cpg=2),
    # nonzero mean, default affine params from the module wrapper.
    x2 = 1.5 + 3.0 * jax.random.normal(k4, (2, 32, 5, 7, 6), jnp.float32)
    mod = GroupNormModule(32)
    ref2 = group_norm_ref(x2, mod.gamma, mod.beta)

    y2_f = mod(x2)                 # fused path, unpadded full-S block
    y2_t = mod(x2, tile_s=128)     # tiled two-pass, ragged last tile masked in-kernel
    _check("fused C=32 S=210", y2_f, ref2)
    _check("tiled C=32 S=210", y2_t, ref2)

    assert y2_f.shape == x2.shape
    assert bool(jnp.all(jnp.isfinite(y2_f))) and bool(jnp.all(jnp.isfinite(y2_t)))
    jax.block_until_ready(y2_t)
    print("KERNEL_OK")
</pallas_src>

<mosaic_0001>
module attributes {stable_mosaic.version = 11 : i64} {
  func.func @_gn_fused_kernel(%arg0: i32, %arg1: memref<1x16x4x256xf32, #tpu.memory_space<vmem>>, %arg2: memref<16x4x1xf32, #tpu.memory_space<vmem>>, %arg3: memref<16x4x1xf32, #tpu.memory_space<vmem>>, %arg4: memref<1x16x4x256xf32, #tpu.memory_space<vmem>>) attributes {dimension_semantics = [#tpu.dimension_semantics<parallel>], iteration_bounds = array<i64: 2>, scalar_prefetch = 0 : i64, scratch_operands = 0 : i64, tpu.core_type = #tpu.core_type<tc>, window_params = [{transform_indices = @transform_0, window_bounds = array<i64: 1, 16, 4, 256>}, {pipeline_mode = #tpu.pipeline_mode<synchronous>, transform_indices = @transform_1, window_bounds = array<i64: 16, 4, 1>}, {pipeline_mode = #tpu.pipeline_mode<synchronous>, transform_indices = @transform_2, window_bounds = array<i64: 16, 4, 1>}, {transform_indices = @transform_3, window_bounds = array<i64: 1, 16, 4, 256>}]} {
    %c0 = arith.constant 0 : index
    %c0_0 = arith.constant 0 : index
    %c0_1 = arith.constant 0 : index
    %c0_2 = arith.constant 0 : index
    %0 = vector.load %arg1[%c0, %c0_0, %c0_1, %c0_2] : memref<1x16x4x256xf32, #tpu.memory_space<vmem>>, vector<1x16x4x256xf32>
    %1 = vector.shape_cast %0 : vector<1x16x4x256xf32> to vector<16x4x256xf32>
    %cst = arith.constant dense<0.000000e+00> : vector<16x4xf32>
    %2 = vector.multi_reduction <add>, %1, %cst [2] : vector<16x4x256xf32> to vector<16x4xf32>
    %3 = vector.shape_cast %2 : vector<16x4xf32> to vector<16x4x1xf32>
    %4 = arith.mulf %1, %1 : vector<16x4x256xf32>
    %cst_3 = arith.constant dense<0.000000e+00> : vector<16x4xf32>
    %5 = vector.multi_reduction <add>, %4, %cst_3 [2] : vector<16x4x256xf32> to vector<16x4xf32>
    %6 = vector.shape_cast %5 : vector<16x4xf32> to vector<16x4x1xf32>
    %cst_4 = arith.constant dense<0.000000e+00> : vector<16x1xf32>
    %7 = vector.multi_reduction <add>, %3, %cst_4 [1] : vector<16x4x1xf32> to vector<16x1xf32>
    %8 = vector.shape_cast %7 : vector<16x1xf32> to vector<16x1x1xf32>
    %cst_5 = arith.constant dense<0.000000e+00> : vector<16x1xf32>
    %9 = vector.multi_reduction <add>, %6, %cst_5 [1] : vector<16x4x1xf32> to vector<16x1xf32>
    %10 = vector.shape_cast %9 : vector<16x1xf32> to vector<16x1x1xf32>
    %cst_6 = arith.constant 9.765625E-4 : f32
    %11 = vector.broadcast %cst_6 : f32 to vector<16x1x1xf32>
    %12 = arith.mulf %8, %11 : vector<16x1x1xf32>
    %cst_7 = arith.constant 9.765625E-4 : f32
    %13 = vector.broadcast %cst_7 : f32 to vector<16x1x1xf32>
    %14 = arith.mulf %10, %13 : vector<16x1x1xf32>
    %15 = arith.mulf %12, %12 : vector<16x1x1xf32>
    %16 = arith.subf %14, %15 : vector<16x1x1xf32>
    %cst_8 = arith.constant 0.000000e+00 : f32
    %17 = vector.broadcast %cst_8 : f32 to vector<16x1x1xf32>
    %18 = arith.maximumf %16, %17 : vector<16x1x1xf32>
    %cst_9 = arith.constant 9.99999997E-7 : f32
    %19 = vector.broadcast %cst_9 : f32 to vector<16x1x1xf32>
    %20 = arith.addf %18, %19 : vector<16x1x1xf32>
    %21 = math.rsqrt %20 : vector<16x1x1xf32>
    %c0_10 = arith.constant 0 : index
    %c0_11 = arith.constant 0 : index
    %c0_12 = arith.constant 0 : index
    %22 = vector.load %arg2[%c0_10, %c0_11, %c0_12] : memref<16x4x1xf32, #tpu.memory_space<vmem>>, vector<16x4x1xf32>
    %23 = vector.broadcast %21 : vector<16x1x1xf32> to vector<16x4x1xf32>
    %24 = arith.mulf %22, %23 : vector<16x4x1xf32>
    %c0_13 = arith.constant 0 : index
    %c0_14 = arith.constant 0 : index
    %c0_15 = arith.constant 0 : index
    %25 = vector.load %arg3[%c0_13, %c0_14, %c0_15] : memref<16x4x1xf32, #tpu.memory_space<vmem>>, vector<16x4x1xf32>
    %26 = vector.broadcast %12 : vector<16x1x1xf32> to vector<16x4x1xf32>
    %27 = arith.mulf %26, %24 : vector<16x4x1xf32>
    %28 = arith.subf %25, %27 : vector<16x4x1xf32>
    %29 = vector.broadcast %24 : vector<16x4x1xf32> to vector<16x4x256xf32>
    %30 = arith.mulf %1, %29 : vector<16x4x256xf32>
    %31 = vector.broadcast %28 : vector<16x4x1xf32> to vector<16x4x256xf32>
    %32 = arith.addf %30, %31 : vector<16x4x256xf32>
    %c0_16 = arith.constant 0 : index
    %c0_17 = arith.constant 0 : index
    %c0_18 = arith.constant 0 : index
    %c0_19 = arith.constant 0 : index
    %33 = vector.load %arg4[%c0_16, %c0_17, %c0_18, %c0_19] : memref<1x16x4x256xf32, #tpu.memory_space<vmem>>, vector<1x16x4x256xf32>
    %34 = vector.shape_cast %33 : vector<1x16x4x256xf32> to vector<16x4x256xf32>
    %35 = vector.shape_cast %32 : vector<16x4x256xf32> to vector<1x16x4x256xf32>
    tpu.vector_store %arg4[%c0_16, %c0_17, %c0_18, %c0_19], %35 {strides = array<i32>} : memref<1x16x4x256xf32, #tpu.memory_space<vmem>>, vector<1x16x4x256xf32>,
    return
  }
  func.func @transform_0(%arg0: i32) -> (i32, i32, i32, i32) {
    %c0_i32 = arith.constant 0 : i32
    %c0_i32_0 = arith.constant 0 : i32
    %c0_i32_1 = arith.constant 0 : i32
    %c0_i32_2 = arith.constant 0 : i32
    return %arg0, %c0_i32, %c0_i32_0, %c0_i32_1 : i32, i32, i32, i32
  }
  func.func @transform_1(%arg0: i32) -> (i32, i32, i32) {
    %c0_i32 = arith.constant 0 : i32
    %c0_i32_0 = arith.constant 0 : i32
    %c0_i32_1 = arith.constant 0 : i32
    %c0_i32_2 = arith.constant 0 : i32
    return %c0_i32, %c0_i32_0, %c0_i32_1 : i32, i32, i32
  }
  func.func @transform_2(%arg0: i32) -> (i32, i32, i32) {
    %c0_i32 = arith.constant 0 : i32
    %c0_i32_0 = arith.constant 0 : i32
    %c0_i32_1 = arith.constant 0 : i32
    %c0_i32_2 = arith.constant 0 : i32
    return %c0_i32, %c0_i32_0, %c0_i32_1 : i32, i32, i32
  }
  func.func @transform_3(%arg0: i32) -> (i32, i32, i32, i32) {
    %c0_i32 = arith.constant 0 : i32
    %c0_i32_0 = arith.constant 0 : i32
    %c0_i32_1 = arith.constant 0 : i32
    %c0_i32_2 = arith.constant 0 : i32
    return %arg0, %c0_i32, %c0_i32_0, %c0_i32_1 : i32, i32, i32, i32
  }
}

</mosaic_0001>

<bundles_post_ra>
// kernel: group_norm.1
= control target key start
LH: loop header
LB: loop body
LE: loop exit
PB: predicated region body
PF: predicated region fallthrough
CT: control target
= control target key end

     0   :  { %s1482_s12 = smov 0   ;;  %s2079_s0 = inlined_call_operand.vmem [shape: f32[2,16,4,256], index: 0, kind: input, shape index: {}]   ;;  %s2080_s1 = inlined_call_operand.vmem [shape: f32[16,4,1], index: 1, kind: input, shape index: {}]   ;;  %s2081_s2 = inlined_call_operand.vmem [shape: f32[16,4,1], index: 2, kind: input, shape index: {}]   ;;  %s2082_s3 = inlined_call_operand.vmem [shape: f32[2,16,4,256], index: 3, kind: output, shape index: {}]  }
   0x1 LB: > { %s1363_s13 = sadd.s32 4294967295, %s1458_s12   ;;  %p1367_p0 = scmp.ge.s32.totalorder %s1458_s12, 1  ;;  %s1458_s12 = sphi %s1482_s12, %s13_s12  }
   0x2   : > { %p137_p1 = scmp.lt.s32.totalorder %s1458_s12, 3 }
   0x4   : > { %p138_p2 = pnand %p1367_p0, %p137_p1 }
   0x5   : > { %p161_p3 = scmp.lt.s32.totalorder (!%p138_p2), %s1363_s13, 1 }
   0x6   : > { %141 = sbr.rel (%p138_p2) target bundleno = 440 (0x1b8), region = 32 }
   0xb   : > { %s2084_s13 = smov (!%p161_p3, %s1363_s13), 1  ;;  %vm235_vm0 = vcmask 1043456  }
   0xc   : > { %s1374_s14 = sshll.u32 %s2084_s13, 7 }
   0xd   : > { %s1498_s17 = scalar_lea.vmem %s2079_s0, %s1374_s14  ;;  %s2000_s11 = scalar_lea.vmem %s2082_s3, %s1374_s14 }
   0xe   : > { %v1501_v0 = vld [vmem:[%s1498_s17 + $0x10] sm:$0xff]  ;;  %v1504_v1 = vld [vmem:[%s1498_s17] sm:$0xff]  ;;  %v1507_v2 = vld [vmem:[%s1498_s17 + $0x18] sm:$0xff] }
   0xf   : > { %v205_v3 = vcombine.high %v1501_v0, %v1501_v0  ;;  %v246_v4 = vsel %vm235_vm0, %v1501_v0, 0.0  ;;  %v203_v5 = vcombine.high %v1504_v1, %v1504_v1  ;;  %v236_v6 = vsel %vm235_vm0, %v1504_v1, 0.0  ;;  %v1518_v7 = vld [vmem:[%s1498_s17 + $0x8] sm:$0xff]  ;;  %v1530_v12 = vld [vmem:[%s1498_s17 + $0x20] sm:$0xff]  ;;  %v1539_v17 = vld [vmem:[%s1498_s17 + $0x38] sm:$0xff] }
  0x10   : > { %v1521_v8 = vld [vmem:[%s1498_s17 + $0x28] sm:$0xff]  ;;  %v206_v9 = vcombine.high %v1507_v2, %v1507_v2  ;;  %v251_v10 = vsel %vm235_vm0, %v1507_v2, 0.0  ;;  %v204_v11 = vcombine.high %v1518_v7, %v1518_v7  ;;  %v241_v15 = vsel %vm235_vm0, %v1518_v7, 0.0  ;;  %v1544_v22 = vld [vmem:[%s1498_s17 + $0x30] sm:$0xff]  ;;  %v1562_v33 = vld [vmem:[%s1498_s17 + $0x40] sm:$0xff] }
  0x11   : > { %v247_v13 = vsel %vm235_vm0, %v205_v3, 0.0  ;;  %v237_v14 = vsel %vm235_vm0, %v203_v5, 0.0  ;;  %v208_v16 = vcombine.high %v1521_v8, %v1521_v8  ;;  %v261_v23 = vsel %vm235_vm0, %v1521_v8, 0.0  ;;  %v1554_v29 = vld [vmem:[%s1498_s17 + $0x48] sm:$0xff]  ;;  %v1575_v42 = vld [vmem:[%s1498_s17 + $0x58] sm:$0xff]  ;;  %v1578_v43 = vld [vmem:[%s1498_s17 + $0x50] sm:$0xff] }
  0x12   : > { %v248_v18 = vadd.f32 %v247_v13, %v246_v4  ;;  %v238_v19 = vadd.f32 %v237_v14, %v236_v6  ;;  %v252_v20 = vsel %vm235_vm0, %v206_v9, 0.0  ;;  %v242_v21 = vsel %vm235_vm0, %v204_v11, 0.0  ;;  %v1591_v52 = vld [vmem:[%s1498_s17 + $0x68] sm:$0xff]  ;;  %v1594_v53 = vld [vmem:[%s1498_s17 + $0x60] sm:$0xff]  ;;  %v1607_v62 = vld [vmem:[%s1498_s17 + $0x78] sm:$0xff] }
  0x13   : > { %v207_v24 = vcombine.high %v1530_v12, %v1530_v12  ;;  %v253_v25 = vadd.f32 %v252_v20, %v251_v10  ;;  %v243_v26 = vadd.f32 %v242_v21, %v241_v15  ;;  %v262_v27 = vsel %vm235_vm0, %v208_v16, 0.0  ;;  %v1610_v63 = vld [vmem:[%s1498_s17 + $0x70] sm:$0xff] }
  0x14   : > { %249 = vadd.xlane.f32.xlu1 %v248_v18  ;;  %239 = vadd.xlane.f32.xlu0 %v238_v19  ;;  %v210_v28 = vcombine.high %v1539_v17, %v1539_v17  ;;  %v256_v30 = vsel %vm235_vm0, %v1530_v12, 0.0  ;;  %v209_v32 = vcombine.high %v1544_v22, %v1544_v22  ;;  %v263_v34 = vadd.f32 %v262_v27, %v261_v23 }
  0x15   : > { %v257_v31 = vsel %vm235_vm0, %v207_v24, 0.0  ;;  %v212_v35 = vcombine.high %v1554_v29, %v1554_v29  ;;  %v271_v37 = vsel %vm235_vm0, %v1539_v17, 0.0  ;;  %v211_v39 = vcombine.high %v1562_v33, %v1562_v33 }
  0x16   : > { %v258_v36 = vadd.f32 %v257_v31, %v256_v30  ;;  %v272_v38 = vsel %vm235_vm0, %v210_v28, 0.0  ;;  %v266_v40 = vsel %vm235_vm0, %v1544_v22, 0.0  ;;  %v267_v41 = vsel %vm235_vm0, %v209_v32, 0.0 }
  0x17   : > { %v273_v44 = vadd.f32 %v272_v38, %v271_v37  ;;  %v281_v45 = vsel %vm235_vm0, %v1554_v29, 0.0  ;;  %v282_v46 = vsel %vm235_vm0, %v212_v35, 0.0  ;;  %v276_v47 = vsel %vm235_vm0, %v1562_v33, 0.0 }
  0x18   : > { %254 = vadd.xlane.f32.xlu1 %v253_v25  ;;  %244 = vadd.xlane.f32.xlu0 %v243_v26  ;;  %v268_v48 = vadd.f32 %v267_v41, %v266_v40  ;;  %v277_v49 = vsel %vm235_vm0, %v211_v39, 0.0  ;;  %v214_v50 = vcombine.high %v1575_v42, %v1575_v42  ;;  %v213_v51 = vcombine.high %v1578_v43, %v1578_v43 }
  0x19   : > { %v283_v54 = vadd.f32 %v282_v46, %v281_v45  ;;  %v278_v55 = vadd.f32 %v277_v49, %v276_v47  ;;  %v291_v56 = vsel %vm235_vm0, %v1575_v42, 0.0  ;;  %v286_v57 = vsel %vm235_vm0, %v1578_v43, 0.0 }
  0x1a   : > { %v292_v58 = vsel %vm235_vm0, %v214_v50, 0.0  ;;  %v287_v59 = vsel %vm235_vm0, %v213_v51, 0.0  ;;  %v216_v60 = vcombine.high %v1591_v52, %v1591_v52  ;;  %v215_v61 = vcombine.high %v1594_v53, %v1594_v53 }
  0x1b   : > { %v301_v3 = vsel %vm235_vm0, %v1591_v52, 0.0  ;;  %v293_v4 = vadd.f32 %v292_v58, %v291_v56  ;;  %v288_v5 = vadd.f32 %v287_v59, %v286_v57  ;;  %v296_v6 = vsel %vm235_vm0, %v1594_v53, 0.0 }
  0x1c   : > { %264 = vadd.xlane.f32.xlu1 %v263_v34  ;;  %259 = vadd.xlane.f32.xlu0 %v258_v36  ;;  %v218_v9 = vcombine.high %v1607_v62, %v1607_v62  ;;  %v302_v10 = vsel %vm235_vm0, %v216_v60, 0.0  ;;  %v297_v11 = vsel %vm235_vm0, %v215_v61, 0.0  ;;  %v217_v13 = vcombine.high %v1610_v63, %v1610_v63 }
  0x1d   : > { %v317_v14 = vmul.f32 %v1518_v7, %v1518_v7  ;;  %v316_v15 = vmul.f32 %v1504_v1, %v1504_v1  ;;  %v311_v16 = vsel %vm235_vm0, %v1607_v62, 0.0  ;;  %v303_v18 = vadd.f32 %v302_v10, %v301_v3 }
  0x1e   : > { %v298_v19 = vadd.f32 %v297_v11, %v296_v6  ;;  %v312_v20 = vsel %vm235_vm0, %v218_v9, 0.0  ;;  %v306_v21 = vsel %vm235_vm0, %v1610_v63, 0.0  ;;  %v307_v23 = vsel %vm235_vm0, %v217_v13, 0.0 }
  0x1f   : > { %v349_v24 = vcombine.high %v317_v14, %v317_v14  ;;  %v319_v7 = vmul.f32 %v1507_v2, %v1507_v2  ;;  %v318_v1 = vmul.f32 %v1501_v0, %v1501_v0  ;;  %v348_v25 = vcombine.high %v316_v15, %v316_v15 }
  0x20   : > { %274 = vadd.xlane.f32.xlu1 %v273_v44  ;;  %269 = vadd.xlane.f32.xlu0 %v268_v48  ;;  %v313_v26 = vadd.f32 %v312_v20, %v311_v16  ;;  %v308_v27 = vadd.f32 %v307_v23, %v306_v21  ;;  %v321_v28 = vmul.f32 %v1521_v8, %v1521_v8  ;;  %v385_v30 = vsel %vm235_vm0, %v317_v14, 0.0 }
  0x21   : > { %v386_v31 = vsel %vm235_vm0, %v349_v24, 0.0  ;;  %v351_v32 = vcombine.high %v319_v7, %v319_v7  ;;  %v350_v34 = vcombine.high %v318_v1, %v318_v1  ;;  %v380_v35 = vsel %vm235_vm0, %v316_v15, 0.0 }
  0x22   : > { %v381_v2 = vsel %vm235_vm0, %v348_v25, 0.0  ;;  %v320_v0 = vmul.f32 %v1530_v12, %v1530_v12  ;;  %v387_v36 = vadd.f32 %v386_v31, %v385_v30  ;;  %v395_v37 = vsel %vm235_vm0, %v319_v7, 0.0 }
  0x23   : > { %v390_v8 = vsel %vm235_vm0, %v318_v1, 0.0  ;;  %v353_v38 = vcombine.high %v321_v28, %v321_v28  ;;  %v382_v39 = vadd.f32 %v381_v2, %v380_v35  ;;  %v396_v40 = vsel %vm235_vm0, %v351_v32, 0.0 }
  0x24   : > { %284 = vadd.xlane.f32.xlu1 %v283_v54  ;;  %279 = vadd.xlane.f32.xlu0 %v278_v55  ;;  %v391_v41 = vsel %vm235_vm0, %v350_v34, 0.0  ;;  %v323_v44 = vmul.f32 %v1539_v17, %v1539_v17  ;;  %v352_v45 = vcombine.high %v320_v0, %v320_v0  ;;  %v322_v12 = vmul.f32 %v1544_v22, %v1544_v22 }
  0x25   : > { %v397_v46 = vadd.f32 %v396_v40, %v395_v37  ;;  %v392_v47 = vadd.f32 %v391_v41, %v390_v8  ;;  %v405_v48 = vsel %vm235_vm0, %v321_v28, 0.0  ;;  %v406_v49 = vsel %vm235_vm0, %v353_v38, 0.0 }
  0x26   : > { %v355_v50 = vcombine.high %v323_v44, %v323_v44  ;;  %v325_v51 = vmul.f32 %v1554_v29, %v1554_v29  ;;  %v324_v54 = vmul.f32 %v1562_v33, %v1562_v33  ;;  %v400_v17 = vsel %vm235_vm0, %v320_v0, 0.0 }
  0x27   : > { %v401_v55 = vsel %vm235_vm0, %v352_v45, 0.0  ;;  %v354_v22 = vcombine.high %v322_v12, %v322_v12  ;;  %v407_v56 = vadd.f32 %v406_v49, %v405_v48  ;;  %v415_v57 = vsel %vm235_vm0, %v323_v44, 0.0 }
  0x28   : > { %294 = vadd.xlane.f32.xlu1 %v293_v4  ;;  %289 = vadd.xlane.f32.xlu0 %v288_v5  ;;  %v327_v58 = vmul.f32 %v1575_v42, %v1575_v42  ;;  %v402_v59 = vadd.f32 %v401_v55, %v400_v17  ;;  %v416_v60 = vsel %vm235_vm0, %v355_v50, 0.0  ;;  %v357_v29 = vcombine.high %v325_v51, %v325_v51 }
  0x29   : > { %v356_v61 = vcombine.high %v324_v54, %v324_v54  ;;  %v410_v33 = vsel %vm235_vm0, %v322_v12, 0.0  ;;  %v411_v3 = vsel %vm235_vm0, %v354_v22, 0.0  ;;  %v326_v4 = vmul.f32 %v1578_v43, %v1578_v43 }
  0x2a   : > { %v417_v5 = vadd.f32 %v416_v60, %v415_v57  ;;  %v425_v6 = vsel %vm235_vm0, %v325_v51, 0.0  ;;  %v420_v9 = vsel %vm235_vm0, %v324_v54, 0.0  ;;  %v412_v42 = vadd.f32 %v411_v3, %v410_v33 }
  0x2b   : > { %v426_v10 = vsel %vm235_vm0, %v357_v29, 0.0  ;;  %v421_v11 = vsel %vm235_vm0, %v356_v61, 0.0  ;;  %v359_v13 = vcombine.high %v327_v58, %v327_v58  ;;  %v358_v14 = vcombine.high %v326_v4, %v326_v4 }
  0x2c   : > { %304 = vadd.xlane.f32.xlu1 %v303_v18  ;;  %299 = vadd.xlane.f32.xlu0 %v298_v19  ;;  %v329_v15 = vmul.f32 %v1591_v52, %v1591_v52  ;;  %v328_v43 = vmul.f32 %v1594_v53, %v1594_v53  ;;  %v427_v16 = vadd.f32 %v426_v10, %v425_v6  ;;  %v435_v19 = vsel %vm235_vm0, %v327_v58, 0.0 }
  0x2d   : > { %v422_v18 = vadd.f32 %v421_v11, %v420_v9  ;;  %v436_v20 = vsel %vm235_vm0, %v359_v13, 0.0  ;;  %v430_v21 = vsel %vm235_vm0, %v326_v4, 0.0  ;;  %v331_v23 = vmul.f32 %v1607_v62, %v1607_v62 }
  0x2e   : > { %v431_v24 = vsel %vm235_vm0, %v358_v14, 0.0  ;;  %v361_v7 = vcombine.high %v329_v15, %v329_v15  ;;  %v360_v52 = vcombine.high %v328_v43, %v328_v43  ;;  %v330_v53 = vmul.f32 %v1610_v63, %v1610_v63 }
  0x2f   : > { %v437_v1 = vadd.f32 %v436_v20, %v435_v19  ;;  %v432_v25 = vadd.f32 %v431_v24, %v430_v21  ;;  %v363_v62 = vcombine.high %v331_v23, %v331_v23  ;;  %v455_v63 = vsel %vm235_vm0, %v331_v23, 0.0 }
  0x30   : > { %314 = vadd.xlane.f32.xlu1 %v313_v26  ;;  %309 = vadd.xlane.f32.xlu0 %v308_v27  ;;  %v445_v26 = vsel %vm235_vm0, %v329_v15, 0.0  ;;  %v440_v27 = vsel %vm235_vm0, %v328_v43, 0.0  ;;  %v446_v28 = vsel %vm235_vm0, %v361_v7, 0.0  ;;  %v441_v30 = vsel %vm235_vm0, %v360_v52, 0.0 }
  0x31   : > { %v362_v31 = vcombine.high %v330_v53, %v330_v53  ;;  %v447_v32 = vadd.f32 %v446_v28, %v445_v26  ;;  %v442_v34 = vadd.f32 %v441_v30, %v440_v27  ;;  %v456_v35 = vsel %vm235_vm0, %v363_v62, 0.0 }
  0x32   : > { %v450_v2 = vsel %vm235_vm0, %v330_v53, 0.0  ;;  %v1460_v8 = vmov 0  }
  0x33   : > { %v451_v0 = vsel %vm235_vm0, %v362_v31, 0.0  ;;  %1387 = vset.pattern.permute.xlu1 %v1460_v8  ;;  %1386 = vset.pattern.permute.xlu0 %v1460_v8 }
  0x34   : > { %388 = vadd.xlane.f32.xlu1 %v387_v36  ;;  %383 = vadd.xlane.f32.xlu0 %v382_v39  ;;  %v457_v36 = vadd.f32 %v456_v35, %v455_v63  ;;  %v452_v37 = vadd.f32 %v451_v0, %v450_v2 }
  0x38   : > { %398 = vadd.xlane.f32.xlu1 %v397_v46  ;;  %393 = vadd.xlane.f32.xlu0 %v392_v47 }
  0x3c   : > { %408 = vadd.xlane.f32.xlu1 %v407_v56  ;;  %403 = vadd.xlane.f32.xlu0 %v402_v59 }
  0x40   : > { %418 = vadd.xlane.f32.xlu1 %v417_v5  ;;  %413 = vadd.xlane.f32.xlu0 %v412_v42 }
  0x44   : > { %428 = vadd.xlane.f32.xlu1 %v427_v16  ;;  %423 = vadd.xlane.f32.xlu0 %v422_v18 }
  0x48   : > { %438 = vadd.xlane.f32.xlu1 %v437_v1  ;;  %433 = vadd.xlane.f32.xlu0 %v432_v25 }
  0x4c   : > { %448 = vadd.xlane.f32.xlu1 %v447_v32  ;;  %443 = vadd.xlane.f32.xlu0 %v442_v34 }
  0x50   : > { %458 = vadd.xlane.f32.xlu1 %v457_v36  ;;  %453 = vadd.xlane.f32.xlu0 %v452_v37 }
  0x9d   : > { %v250_v38 = vpop.xlane.xlu1 %249  ;;  %v240_v39 = vpop.xlane.xlu0 %239 }
  0x9e   : > { %v474_v40 = vsel %vm235_vm0, %v250_v38, 0.0  ;;  %v460_v41 = vsel %vm235_vm0, %v240_v39, 0.0 }
  0x9f   : > { %v475_v44 = vrot.slane %v474_v40, 4  ;;  %v461_v45 = vrot.slane %v460_v41, 4 }
  0xa1   : > { %v476_v12 = vadd.f32 %v475_v44, %v474_v40  ;;  %v462_v46 = vadd.f32 %v461_v45, %v460_v41  ;;  %v255_v47 = vpop.xlane.xlu1 %254  ;;  %v245_v48 = vpop.xlane.xlu0 %244 }
  0xa2   : > { %v481_v49 = vsel %vm235_vm0, %v255_v47, 0.0  ;;  %v467_v50 = vsel %vm235_vm0, %v245_v48, 0.0 }
  0xa3   : > { %v477_v51 = vrot.slane %v476_v12, 2  ;;  %v463_v54 = vrot.slane %v462_v46, 2  ;;  %v482_v17 = vrot.slane %v481_v49, 4  ;;  %v468_v55 = vrot.slane %v467_v50, 4 }
  0xa5   : > { %v478_v22 = vadd.f32 %v477_v51, %v476_v12  ;;  %v464_v56 = vadd.f32 %v463_v54, %v462_v46  ;;  %v483_v57 = vadd.f32 %v482_v17, %v481_v49  ;;  %v469_v58 = vadd.f32 %v468_v55, %v467_v50  ;;  %v265_v59 = vpop.xlane.xlu1 %264  ;;  %v260_v60 = vpop.xlane.xlu0 %259 }
  0xa6   : > { %v495_v29 = vsel %vm235_vm0, %v265_v59, 0.0  ;;  %v488_v61 = vsel %vm235_vm0, %v260_v60, 0.0 }
  0xa7   : > { %v479_v33 = vrot.slane %v478_v22, 1  ;;  %v465_v3 = vrot.slane %v464_v56, 1  ;;  %v484_v4 = vrot.slane %v483_v57, 2  ;;  %v470_v5 = vrot.slane %v469_v58, 2 }
  0xa8   : > { %v496_v6 = vrot.slane %v495_v29, 4  ;;  %v489_v9 = vrot.slane %v488_v61, 4 }
  0xa9   : > { %v275_v42 = vpop.xlane.xlu1 %274  ;;  %v270_v10 = vpop.xlane.xlu0 %269  ;;  %v480_v43 = vadd.f32 %v479_v33, %v478_v22  ;;  %v466_v16 = vadd.f32 %v465_v3, %v464_v56  ;;  %v485_v18 = vadd.f32 %v484_v4, %v483_v57  ;;  %v471_v19 = vadd.f32 %v470_v5, %v469_v58 }
  0xaa   : > { %v497_v11 = vadd.f32 %v496_v6, %v495_v29  ;;  %v490_v13 = vadd.f32 %v489_v9, %v488_v61  ;;  %v509_v14 = vsel %vm235_vm0, %v275_v42, 0.0  ;;  %v502_v15 = vsel %vm235_vm0, %v270_v10, 0.0 }
  0xab   : > { %v510_v23 = vrot.slane %v509_v14, 4  ;;  %v503_v24 = vrot.slane %v502_v15, 4  ;;  %v1700_v27 = vmul.f32 0.0009765625, %v480_v43  ;;  %v1702_v28 = vmul.f32 0.0009765625, %v466_v16 }
  0xac   : > { %v498_v20 = vrot.slane %v497_v11, 2  ;;  %v491_v21 = vrot.slane %v490_v13, 2  ;;  %v486_v31 = vrot.slane %v485_v18, 1  ;;  %v472_v32 = vrot.slane %v471_v19, 1 }
  0xad   : > { %v285_v7 = vpop.xlane.xlu1 %284  ;;  %v280_v52 = vpop.xlane.xlu0 %279  ;;  %v511_v25 = vadd.f32 %v510_v23, %v509_v14  ;;  %v504_v26 = vadd.f32 %v503_v24, %v502_v15  ;;  %v1710_v12 = vmul.f32 %v1700_v27, %v1700_v27  ;;  %v1714_v46 = vmul.f32 %v1702_v28, %v1702_v28 }
  0xae   : > { %v499_v53 = vadd.f32 %v498_v20, %v497_v11  ;;  %v492_v1 = vadd.f32 %v491_v21, %v490_v13  ;;  %v523_v30 = vsel %vm235_vm0, %v285_v7, 0.0  ;;  %v516_v62 = vsel %vm235_vm0, %v280_v52, 0.0 }
  0xaf   : > { %v512_v34 = vrot.slane %v511_v25, 2  ;;  %v505_v63 = vrot.slane %v504_v26, 2  ;;  %v524_v35 = vrot.slane %v523_v30, 4  ;;  %v517_v2 = vrot.slane %v516_v62, 4 }
  0xb0   : > { %v500_v37 = vrot.slane %v499_v53, 1  ;;  %v493_v8 = vrot.slane %v492_v1, 1  ;;  %v487_v47 = vadd.f32 %v486_v31, %v485_v18  ;;  %v473_v48 = vadd.f32 %v472_v32, %v471_v19 }
  0xb1   : > { %v295_v0 = vpop.xlane.xlu1 %294  ;;  %v290_v36 = vpop.xlane.xlu0 %289  ;;  %v513_v38 = vadd.f32 %v512_v34, %v511_v25  ;;  %v506_v39 = vadd.f32 %v505_v63, %v504_v26  ;;  %v525_v40 = vadd.f32 %v524_v35, %v523_v30  ;;  %v518_v41 = vadd.f32 %v517_v2, %v516_v62 }
  0xb2   : > { %v537_v44 = vsel %vm235_vm0, %v295_v0, 0.0  ;;  %v530_v45 = vsel %vm235_vm0, %v290_v36, 0.0  ;;  %v501_v22 = vadd.f32 %v500_v37, %v499_v53  ;;  %v494_v56 = vadd.f32 %v493_v8, %v492_v1 }
  0xb3   : > { %v526_v49 = vrot.slane %v525_v40, 2  ;;  %v519_v50 = vrot.slane %v518_v41, 2  ;;  %v538_v51 = vrot.slane %v537_v44, 4  ;;  %v531_v54 = vrot.slane %v530_v45, 4 }
  0xb4   : > { %v514_v57 = vrot.slane %v513_v38, 1  ;;  %v507_v58 = vrot.slane %v506_v39, 1  ;;  %v1716_v33 = vmul.f32 0.0009765625, %v487_v47  ;;  %v1718_v3 = vmul.f32 0.0009765625, %v473_v48 }
  0xb5   : > { %v305_v17 = vpop.xlane.xlu1 %304  ;;  %v300_v55 = vpop.xlane.xlu0 %299  ;;  %v527_v59 = vadd.f32 %v526_v49, %v525_v40  ;;  %v520_v60 = vadd.f32 %v519_v50, %v518_v41  ;;  %v539_v29 = vadd.f32 %v538_v51, %v537_v44  ;;  %v532_v61 = vadd.f32 %v531_v54, %v530_v45 }
  0xb6   : > { %v551_v4 = vsel %vm235_vm0, %v305_v17, 0.0  ;;  %v544_v5 = vsel %vm235_vm0, %v300_v55, 0.0  ;;  %v1722_v14 = vmul.f32 0.0009765625, %v501_v22  ;;  %v1724_v15 = vmul.f32 0.0009765625, %v494_v56 }
  0xb7   : > { %v528_v6 = vrot.slane %v527_v59, 1  ;;  %v521_v9 = vrot.slane %v520_v60, 1  ;;  %v540_v42 = vrot.slane %v539_v29, 2  ;;  %v533_v10 = vrot.slane %v532_v61, 2 }
  0xb8   : > { %v552_v43 = vrot.slane %v551_v4, 4  ;;  %v545_v16 = vrot.slane %v544_v5, 4  ;;  %v515_v18 = vadd.f32 %v514_v57, %v513_v38  ;;  %v508_v19 = vadd.f32 %v507_v58, %v506_v39 }
  0xb9   : > { %v315_v11 = vpop.xlane.xlu1 %314  ;;  %v310_v13 = vpop.xlane.xlu0 %309  ;;  %v541_v20 = vadd.f32 %v540_v42, %v539_v29  ;;  %v534_v21 = vadd.f32 %v533_v10, %v532_v61  ;;  %v529_v53 = vadd.f32 %v528_v6, %v527_v59  ;;  %v522_v1 = vadd.f32 %v521_v9, %v520_v60 }
  0xba   : > { %v553_v23 = vadd.f32 %v552_v43, %v551_v4  ;;  %v546_v24 = vadd.f32 %v545_v16, %v544_v5  ;;  %v565_v7 = vsel %vm235_vm0, %v315_v11, 0.0  ;;  %v558_v52 = vsel %vm235_vm0, %v310_v13, 0.0 }
  0xbb   : > { %v542_v25 = vrot.slane %v541_v20, 1  ;;  %v535_v26 = vrot.slane %v534_v21, 1  ;;  %v566_v34 = vrot.slane %v565_v7, 4  ;;  %v559_v63 = vrot.slane %v558_v52, 4 }
  0xbc   : > { %v554_v31 = vrot.slane %v553_v23, 2  ;;  %v547_v32 = vrot.slane %v546_v24, 2  ;;  %v1730_v35 = vmul.f32 %v1716_v33, %v1716_v33  ;;  %v1734_v2 = vmul.f32 %v1718_v3, %v1718_v3 }
  0xbd   : > { %v389_v30 = vpop.xlane.xlu1 %388  ;;  %v384_v62 = vpop.xlane.xlu0 %383  ;;  %v1736_v0 = vmul.f32 0.0009765625, %v515_v18  ;;  %v1738_v36 = vmul.f32 0.0009765625, %v508_v19  ;;  %v543_v37 = vadd.f32 %v542_v25, %v541_v20  ;;  %v536_v8 = vadd.f32 %v535_v26, %v534_v21 }
  0xbe   : > { %v555_v38 = vadd.f32 %v554_v31, %v553_v23  ;;  %v567_v39 = vadd.f32 %v566_v34, %v565_v7  ;;  %v1742_v40 = vmul.f32 %v1722_v14, %v1722_v14  ;;  %v1746_v41 = vmul.f32 %v1724_v15, %v1724_v15 }
  0xbf   : > { %v579_v44 = vsel %vm235_vm0, %v389_v30, 0.0  ;;  %v572_v45 = vsel %vm235_vm0, %v384_v62, 0.0  ;;  %v1750_v49 = vmul.f32 0.0009765625, %v529_v53  ;;  %v1752_v50 = vmul.f32 0.0009765625, %v522_v1 }
  0xc0   : > { %v548_v51 = vadd.f32 %v547_v32, %v546_v24  ;;  %v560_v54 = vadd.f32 %v559_v63, %v558_v52  ;;  %v1756_v17 = vmul.f32 %v1736_v0, %v1736_v0  ;;  %v1760_v55 = vmul.f32 %v1738_v36, %v1738_v36 }
  0xc1   : > { %v399_v47 = vpop.xlane.xlu1 %398  ;;  %v394_v48 = vpop.xlane.xlu0 %393  ;;  %v580_v22 = vrot.slane %v579_v44, 4  ;;  %v573_v56 = vrot.slane %v572_v45, 4  ;;  %v1762_v57 = vmul.f32 0.0009765625, %v543_v37  ;;  %v1764_v58 = vmul.f32 0.0009765625, %v536_v8 }
  0xc2   : > { %v556_v59 = vrot.slane %v555_v38, 1  ;;  %v568_v60 = vrot.slane %v567_v39, 2  ;;  %v593_v4 = vsel %vm235_vm0, %v399_v47, 0.0  ;;  %v586_v5 = vsel %vm235_vm0, %v394_v48, 0.0 }
  0xc3   : > { %v581_v29 = vadd.f32 %v580_v22, %v579_v44  ;;  %v574_v61 = vadd.f32 %v573_v56, %v572_v45  ;;  %v1770_v42 = vmul.f32 %v1750_v49, %v1750_v49  ;;  %v1774_v10 = vmul.f32 %v1752_v50, %v1752_v50 }
  0xc4   : > { %v549_v11 = vrot.slane %v548_v51, 1  ;;  %v561_v13 = vrot.slane %v560_v54, 2  ;;  %v594_v18 = vrot.slane %v593_v4, 4  ;;  %v587_v19 = vrot.slane %v586_v5, 4 }
  0xc5   : > { %v409_v6 = vpop.xlane.xlu1 %408  ;;  %v404_v9 = vpop.xlane.xlu0 %403  ;;  %v582_v43 = vrot.slane %v581_v29, 2  ;;  %v575_v16 = vrot.slane %v574_v61, 2  ;;  %v1778_v20 = vmul.f32 %v1762_v57, %v1762_v57  ;;  %v1782_v21 = vmul.f32 %v1764_v58, %v1764_v58 }
  0xc6   : > { %v557_v23 = vadd.f32 %v556_v59, %v555_v38  ;;  %v569_v24 = vadd.f32 %v568_v60, %v567_v39  ;;  %v595_v53 = vadd.f32 %v594_v18, %v593_v4  ;;  %v588_v1 = vadd.f32 %v587_v19, %v586_v5 }
  0xc7   : > { %v583_v7 = vadd.f32 %v582_v43, %v581_v29  ;;  %v576_v52 = vadd.f32 %v575_v16, %v574_v61  ;;  %v550_v25 = vadd.f32 %v549_v11, %v548_v51  ;;  %v1784_v26 = vadd.f32 %v561_v13, %v560_v54 }
  0xc8   : > { %v607_v30 = vsel %vm235_vm0, %v409_v6, 0.0  ;;  %v600_v62 = vsel %vm235_vm0, %v404_v9, 0.0  ;;  %v596_v34 = vrot.slane %v595_v53, 2  ;;  %v589_v63 = vrot.slane %v588_v1, 2 }
  0xc9   : > { %v584_v31 = vrot.slane %v583_v7, 1  ;;  %v577_v32 = vrot.slane %v576_v52, 1  ;;  %v419_v37 = vpop.xlane.xlu1 %418  ;;  %v414_v8 = vpop.xlane.xlu0 %413  ;;  %v1788_v44 = vmul.f32 0.0009765625, %v557_v23  ;;  %v570_v38 = vrot.slane %v569_v24, 1 }
  0xca   : > { %v608_v39 = vrot.slane %v607_v30, 4  ;;  %v601_v45 = vrot.slane %v600_v62, 4  ;;  %v597_v51 = vadd.f32 %v596_v34, %v595_v53  ;;  %v590_v54 = vadd.f32 %v589_v63, %v588_v1 }
  0xcb   : > { %v585_v47 = vadd.f32 %v584_v31, %v583_v7  ;;  %v578_v48 = vadd.f32 %v577_v32, %v576_v52  ;;  %v621_v59 = vsel %vm235_vm0, %v419_v37, 0.0  ;;  %v614_v60 = vsel %vm235_vm0, %v414_v8, 0.0 }
  0xcc   : > { %v609_v22 = vadd.f32 %v608_v39, %v607_v30  ;;  %v602_v56 = vadd.f32 %v601_v45, %v600_v62  ;;  %v598_v4 = vrot.slane %v597_v51, 1  ;;  %v591_v5 = vrot.slane %v590_v54, 1 }
  0xcd   : > { %v701_v29 = vmul.f32 0.0009765625, %v585_v47  ;;  %v700_v61 = vmul.f32 0.0009765625, %v578_v48  ;;  %v622_v11 = vrot.slane %v621_v59, 4  ;;  %v615_v13 = vrot.slane %v614_v60, 4  ;;  %v429_v23 = vpop.xlane.xlu1 %428  ;;  %v424_v34 = vpop.xlane.xlu0 %423 }
  0xce   : > { %v610_v6 = vrot.slane %v609_v22, 2  ;;  %v603_v9 = vrot.slane %v602_v56, 2  ;;  %v599_v18 = vadd.f32 %v598_v4, %v597_v51  ;;  %v592_v19 = vadd.f32 %v591_v5, %v590_v54 }
  0xcf   : > { %v733_v43 = vsub.f32 %v701_v29, %v1734_v2  ;;  %v732_v16 = vsub.f32 %v700_v61, %v1714_v46  ;;  %v623_v53 = vadd.f32 %v622_v11, %v621_v59  ;;  %v616_v1 = vadd.f32 %v615_v13, %v614_v60 }
  0xd0   : > { %v611_v7 = vadd.f32 %v610_v6, %v609_v22  ;;  %v604_v52 = vadd.f32 %v603_v9, %v602_v56  ;;  %v1794_v30 = vmul.f32 0.0009765625, %v550_v25  ;;  %v703_v31 = vmul.f32 0.0009765625, %v599_v18 }
  0xd1   : > { %v749_v62 = vmax.f32 %v733_v43, 0.0  ;;  %v702_v32 = vmul.f32 0.0009765625, %v592_v19  ;;  %v624_v8 = vrot.slane %v623_v53, 2  ;;  %v617_v39 = vrot.slane %v616_v1, 2  ;;  %v439_v29 = vpop.xlane.xlu1 %438  ;;  %v434_v9 = vpop.xlane.xlu0 %433 }
  0xd2   : > { %v612_v63 = vrot.slane %v611_v7, 1  ;;  %v605_v37 = vrot.slane %v604_v52, 1  ;;  %v571_v2 = vadd.f32 %v570_v38, %v569_v24  ;;  %v748_v45 = vmax.f32 %v732_v16, 0.0 }
  0xd3   : > { %v735_v46 = vsub.f32 %v703_v31, %v1730_v35  ;;  %v734_v47 = vsub.f32 %v702_v32, %v1710_v12  ;;  %v625_v54 = vadd.f32 %v624_v8, %v623_v53  ;;  %v618_v22 = vadd.f32 %v617_v39, %v616_v1 }
  0xd4   : > { %v613_v48 = vadd.f32 %v612_v63, %v611_v7  ;;  %v606_v51 = vadd.f32 %v605_v37, %v604_v52  ;;  %v563_v25 = vrot.slane %v1784_v26, 1  ;;  %v765_v56 = vadd.f32 1e-06, %v749_v62 }
  0xd5   : > { %v751_v59 = vmax.f32 %v735_v46, 0.0  ;;  %v635_v60 = vsel %vm235_vm0, %v429_v23, 0.0  ;;  %v750_v61 = vmax.f32 %v734_v47, 0.0  ;;  %v626_v24 = vrot.slane %v625_v54, 1 }
  0xd6   : > { %v705_v4 = vmul.f32 0.0009765625, %v613_v48  ;;  %v704_v5 = vmul.f32 0.0009765625, %v606_v51  ;;  %v1802_v35 = vmul.f32 %v1788_v44, %v1788_v44  ;;  %v1804_v12 = vmul.f32 0.0009765625, %v571_v2 }
  0xd7   : > { %v619_v38 = vrot.slane %v618_v22, 1  ;;  %v636_v6 = vrot.slane %v635_v60, 4  ;;  %v764_v11 = vadd.f32 1e-06, %v748_v45  ;;  %v628_v16 = vsel %vm235_vm0, %v424_v34, 0.0  ;;  %v444_v45 = vpop.xlane.xlu0 %443 }
  0xd8   : > { %v737_v13 = vsub.f32 %v705_v4, %v1742_v40  ;;  %v736_v43 = vsub.f32 %v704_v5, %v1746_v41  ;;  %v1810_v18 = vadd.f32 %v563_v25, %v1784_v26  ;;  %v627_v19 = vadd.f32 %v626_v24, %v625_v54  ;;  %v449_v40 = vpop.xlane.xlu1 %448 }
  0xd9   : > { %v637_v23 = vadd.f32 %v636_v6, %v635_v60  ;;  %v629_v7 = vrot.slane %v628_v16, 4  ;;  %1404 = vrsqrt.f32 %v765_v56  ;;  %v767_v52 = vadd.f32 1e-06, %v751_v59 }
  0xda   : > { %v766_v53 = vadd.f32 1e-06, %v750_v61  ;;  %v620_v1 = vadd.f32 %v619_v38, %v618_v22  ;;  %v753_v62 = vmax.f32 %v737_v13, 0.0  ;;  %v649_v63 = vsel %vm235_vm0, %v439_v29, 0.0 }
  0xdb   : > { %v638_v31 = vrot.slane %v637_v23, 2  ;;  %v630_v32 = vadd.f32 %v629_v7, %v628_v16  ;;  %v1815_v41 = vmul.f32 %v1804_v12, %v1804_v12  ;;  %1406 = vrsqrt.f32 %v764_v11 }
  0xdc   : > { %v752_v26 = vmax.f32 %v736_v43, 0.0  ;;  %v650_v34 = vrot.slane %v649_v63, 4  ;;  %v707_v37 = vmul.f32 0.0009765625, %v627_v19  ;;  %v642_v2 = vsel %vm235_vm0, %v434_v9, 0.0  ;;  %v459_v24 = vpop.xlane.xlu1 %458  ;;  %v454_v19 = vpop.xlane.xlu0 %453 }
  0xdd   : > { %v639_v8 = vadd.f32 %v638_v31, %v637_v23  ;;  %v631_v39 = vrot.slane %v630_v32, 2  ;;  %1408 = vrsqrt.f32 %v767_v52  ;;  %v706_v46 = vmul.f32 0.0009765625, %v620_v1 }
  0xde   : > { %v651_v47 = vadd.f32 %v650_v34, %v649_v63  ;;  %v643_v48 = vrot.slane %v642_v2, 4  ;;  %1410 = vrsqrt.f32 %v766_v53  ;;  %v769_v51 = vadd.f32 1e-06, %v753_v62 }
  0xdf   : > { %v640_v54 = vrot.slane %v639_v8, 1  ;;  %v632_v22 = vadd.f32 %v631_v39, %v630_v32  ;;  %v768_v25 = vadd.f32 1e-06, %v752_v26  ;;  %v663_v60 = vsel %vm235_vm0, %v449_v40, 0.0 }
  0xe0   : > { %v652_v56 = vrot.slane %v651_v47, 2  ;;  %v644_v59 = vadd.f32 %v643_v48, %v642_v2  ;;  %v739_v29 = vsub.f32 %v707_v37, %v1756_v17  ;;  %v664_v5 = vrot.slane %v663_v60, 4 }
  0xe1   : > { %v641_v61 = vadd.f32 %v640_v54, %v639_v8  ;;  %v633_v4 = vrot.slane %v632_v22, 1  ;;  %v738_v38 = vsub.f32 %v706_v46, %v1760_v55  ;;  %v656_v11 = vsel %vm235_vm0, %v444_v45, 0.0 }
  0xe2   : > { %v653_v6 = vadd.f32 %v652_v56, %v651_v47  ;;  %v645_v9 = vrot.slane %v644_v59, 2  ;;  %1412 = vrsqrt.f32 %v769_v51  ;;  %v665_v16 = vadd.f32 %v664_v5, %v663_v60  ;;  %v797_v60 = vld [vmem:[%s2080_s1 + $0x4] sm:$0xf] }
  0xe3   : > { %v709_v13 = vmul.f32 0.0009765625, %v641_v61  ;;  %v634_v43 = vadd.f32 %v633_v4, %v632_v22  ;;  %v657_v52 = vrot.slane %v656_v11, 4  ;;  %v677_v17 = vsel %vm235_vm0, %v459_v24, 0.0 }
  0xe4   : > { %v654_v23 = vrot.slane %v653_v6, 1  ;;  %v646_v7 = vadd.f32 %v645_v9, %v644_v59  ;;  %1414 = vrsqrt.f32 %v768_v25  ;;  %v666_v1 = vrot.slane %v665_v16, 2 }
  0xe5   : > { %v741_v53 = vsub.f32 %v709_v13, %v1770_v42  ;;  %v678_v62 = vrot.slane %v677_v17, 4  ;;  %v658_v32 = vadd.f32 %v657_v52, %v656_v11  ;;  %v670_v63 = vsel %vm235_vm0, %v454_v19, 0.0  ;;  %v798_v13 = vld [vmem:[%s2080_s1 + $0x8] sm:$0xf] }
  0xe6   : > { %v655_v55 = vadd.f32 %v654_v23, %v653_v6  ;;  %v647_v31 = vrot.slane %v646_v7, 1  ;;  %v1405_v40 = vpop.eup %1404  ;;  %v708_v34 = vmul.f32 0.0009765625, %v634_v43  ;;  %v667_v37 = vadd.f32 %v666_v1, %v665_v16 }
  0xe7   : > { %v757_v26 = vmax.f32 %v741_v53, 0.0  ;;  %v679_v8 = vadd.f32 %v678_v62, %v677_v17  ;;  %v659_v45 = vrot.slane %v658_v32, 2  ;;  %v671_v46 = vrot.slane %v670_v63, 4 }
  0xe8   : > { %v711_v39 = vmul.f32 0.0009765625, %v655_v55  ;;  %v648_v2 = vadd.f32 %v647_v31, %v646_v7  ;;  %v1407_v47 = vpop.eup %1406  ;;  %v754_v48 = vmax.f32 %v738_v38, 0.0  ;;  %v668_v42 = vrot.slane %v667_v37, 1  ;;  %v796_v38 = vld [vmem:[%s2080_s1] sm:$0xf] }
  0xe9   : > { %v773_v51 = vadd.f32 1e-06, %v757_v26  ;;  %v680_v54 = vrot.slane %v679_v8, 2  ;;  %v755_v22 = vmax.f32 %v739_v29, 0.0  ;;  %v660_v56 = vadd.f32 %v659_v45, %v658_v32 }
  0xea   : > { %v743_v25 = vsub.f32 %v711_v39, %v1778_v20  ;;  %v672_v59 = vadd.f32 %v671_v46, %v670_v63  ;;  %v1409_v61 = vpop.eup %1408  ;;  %v740_v4 = vsub.f32 %v708_v34, %v1774_v10  ;;  %v669_v5 = vadd.f32 %v668_v42, %v667_v37 }
  0xeb   : > { %1416 = vrsqrt.f32 %v773_v51  ;;  %v681_v24 = vadd.f32 %v680_v54, %v679_v8  ;;  %v1411_v6 = vpop.eup %1410  ;;  %v710_v9 = vmul.f32 0.0009765625, %v648_v2  ;;  %v661_v20 = vrot.slane %v660_v56, 1 }
  0xec   : > { %v759_v29 = vmax.f32 %v743_v25, 0.0  ;;  %v673_v11 = vrot.slane %v672_v59, 2  ;;  %v770_v43 = vadd.f32 1e-06, %v754_v48  ;;  %v713_v16 = vmul.f32 0.0009765625, %v669_v5 }
  0xed   : > { %v682_v19 = vrot.slane %v681_v24, 1  ;;  %v1836_v23 = vmul.f32 %v1405_v40, %v797_v60  ;;  %v771_v10 = vadd.f32 1e-06, %v755_v22  ;;  %v662_v52 = vadd.f32 %v661_v20, %v660_v56  ;;  %v800_v25 = vld [vmem:[%s2080_s1 + $0x10] sm:$0xf] }
  0xee   : > { %v775_v7 = vadd.f32 1e-06, %v759_v29  ;;  %v674_v17 = vadd.f32 %v673_v11, %v672_v59  ;;  %v745_v53 = vsub.f32 %v713_v16, %v1802_v35  ;;  %v1840_v62 = vmul.f32 %v1407_v47, %v796_v38  ;;  %v799_v35 = vld [vmem:[%s2080_s1 + $0xc] sm:$0xf]  ;;  %v801_v38 = vld [vmem:[%s2080_s1 + $0x14] sm:$0xf] }
  0xef   : > { %v683_v1 = vadd.f32 %v682_v19, %v681_v24  ;;  %882 = vperm.xlu1 %1387, %v1836_v23   ;;  %v1842_v55 = vmul.f32 %v1411_v6, %v798_v13  ;;  %v1413_v31 = vpop.eup %1412  ;;  %v756_v32 = vmax.f32 %v740_v4, 0.0  ;;  %v742_v63 = vsub.f32 %v710_v9, %v1782_v21  ;;  %v807_v6 = vld [vmem:[%s2080_s1 + $0x2c] sm:$0xf]  ;;  %v802_v16 = vld [vmem:[%s2080_s1 + $0x18] sm:$0xf] }
  0xf0   : > { %1418 = vrsqrt.f32 %v775_v7  ;;  %v675_v40 = vrot.slane %v674_v17, 1  ;;  %v761_v26 = vmax.f32 %v745_v53, 0.0  ;;  %v712_v34 = vmul.f32 0.0009765625, %v662_v52  ;;  %878 = vperm.xlu0 %1386, %v1840_v62   ;;  %v809_v19 = vld [vmem:[%s2080_s1 + $0x34] sm:$0xf] }
  0xf1   : > { %1420 = vrsqrt.f32 %v770_v43  ;;  %v715_v37 = vmul.f32 0.0009765625, %v683_v1  ;;  %v1415_v8 = vpop.eup %1414  ;;  %v728_v2 = vmul.f32 %v1794_v30, %v1794_v30  ;;  %v1852_v45 = vmul.f32 0.0009765625, %v1810_v18  ;;  %v805_v18 = vld [vmem:[%s2080_s1 + $0x24] sm:$0xf]  ;;  %v803_v53 = vld [vmem:[%s2080_s1 + $0x1c] sm:$0xf] }
  0xf2   : > { %v676_v39 = vadd.f32 %v675_v40, %v674_v17  ;;  %v777_v21 = vadd.f32 1e-06, %v761_v26  ;;  %1422 = vrsqrt.f32 %v771_v10  ;;  %v772_v47 = vadd.f32 1e-06, %v756_v32  ;;  %v804_v26 = vld [vmem:[%s2080_s1 + $0x20] sm:$0xf] }
  0xf3   : > { %v747_v46 = vsub.f32 %v715_v37, %v1815_v41  ;;  %886 = vperm.xlu1 %1387, %v1842_v55   ;;  %v758_v48 = vmax.f32 %v742_v63, 0.0  ;;  %v815_v51 = vmul.f32 %v1409_v61, %v799_v35  ;;  %v744_v42 = vsub.f32 %v712_v34, %v728_v2  ;;  %v829_v35 = vld [vmem:[%s2081_s2 + $0x4] sm:$0xf]  ;;  %v806_v2 = vld [vmem:[%s2080_s1 + $0x28] sm:$0xf] }
  0xf4   : > { %1424 = vrsqrt.f32 %v777_v21  ;;  %v714_v22 = vmul.f32 0.0009765625, %v676_v39  ;;  %v730_v41 = vmul.f32 %v1852_v45, %v1852_v45  ;;  %v1864_v61 = vmul.f32 %v1415_v8, %v800_v25  ;;  %v810_v25 = vld [vmem:[%s2080_s1 + $0x38] sm:$0xf] }
  0xf5   : > { %v763_v54 = vmax.f32 %v747_v46, 0.0  ;;  %1426 = vrsqrt.f32 %v772_v47  ;;  %v774_v60 = vadd.f32 1e-06, %v758_v48  ;;  %v760_v4 = vmax.f32 %v744_v42, 0.0  ;;  %v831_v47 = vld [vmem:[%s2081_s2 + $0xc] sm:$0xf] }
  0xf6   : > { %v746_v5 = vsub.f32 %v714_v22, %v730_v41  ;;  %v817_v11 = vmul.f32 %v1413_v31, %v801_v38  ;;  %v811_v31 = vld [vmem:[%s2080_s1 + $0x3c] sm:$0xf]  ;;  %v845_v37 = vmul.f32 %v1836_v23, %v1718_v3  ;;  %v847_v46 = vmul.f32 %v815_v51, %v1716_v33  ;;  %v808_v48 = vld [vmem:[%s2080_s1 + $0x30] sm:$0xf]  ;;  %v833_v22 = vld [vmem:[%s2081_s2 + $0x14] sm:$0xf] }
  0xf7   : > { %v779_v56 = vadd.f32 1e-06, %v763_v54  ;;  %890 = vperm.xlu1 %1387, %v815_v51   ;;  %v776_v9 = vadd.f32 1e-06, %v760_v4 }
  0xf8   : > { %v1417_v59 = vpop.eup %1416  ;;  %v762_v20 = vmax.f32 %v746_v5, 0.0  ;;  %v861_v21 = vsub.f32 %v829_v35, %v845_v37  ;;  %v863_v42 = vsub.f32 %v831_v47, %v847_v46  ;;  %v849_v54 = vmul.f32 %v817_v11, %v1722_v14 }
  0xf9   : > { %1428 = vrsqrt.f32 %v779_v56  ;;  %v1866_v24 = vmul.f32 %v1417_v59, %v805_v18  ;;  %v835_v56 = vld [vmem:[%s2081_s2 + $0x1c] sm:$0xf]  ;;  %v844_v59 = vmul.f32 %v1840_v62, %v1702_v28  ;;  %v830_v28 = vld [vmem:[%s2081_s2 + $0x8] sm:$0xf]  ;;  %v1461_v35 = vmov 839922192  }
  0xfa   : > { %1430 = vrsqrt.f32 %v774_v60  ;;  %v778_v7 = vadd.f32 1e-06, %v762_v20  ;;  %v865_v18 = vsub.f32 %v833_v22, %v849_v54  ;;  %v828_v60 = vld [vmem:[%s2081_s2] sm:$0xf] }
  0xfb   : > { %894 = vperm.xlu1 %1387, %v1864_v61   ;;  %914 = vperm.xlu0 %1386, %v1866_v24   ;;  %1432 = vrsqrt.f32 %v776_v9  ;;  %v853_v5 = vmul.f32 %v1866_v24, %v1750_v49  ;;  %v860_v38 = vsub.f32 %v828_v60, %v844_v59  ;;  %v839_v49 = vld [vmem:[%s2081_s2 + $0x2c] sm:$0xf]  ;;  %v848_v9 = vmul.f32 %v1864_v61, %v1724_v15  ;;  %v834_v15 = vld [vmem:[%s2081_s2 + $0x18] sm:$0xf] }
  0xfc   : > { %1434 = vrsqrt.f32 %v778_v7  ;;  %v1437_v60 = vld [vmem:[%s1498_s17 + $0x18] sm:$0xff] }
  0xfd   : > { %v1419_v29 = vpop.eup %1418 }
  0xfe   : > { %v1421_v13 = vpop.eup %1420  ;;  %v823_v43 = vmul.f32 %v1419_v29, %v807_v6  ;;  %v846_v6 = vmul.f32 %v1842_v55, %v1700_v27  ;;  %v832_v27 = vld [vmem:[%s2081_s2 + $0x10] sm:$0xf] }
  0xff   : > { %898 = vperm.xlu1 %1387, %v817_v11   ;;  %v1423_v10 = vpop.eup %1422  ;;  %v1882_v52 = vmul.f32 %v1421_v13, %v802_v16  ;;  %v864_v11 = vsub.f32 %v832_v27, %v848_v9 }
 0x100   : > { %922 = vperm.xlu0 %1386, %v823_v43   ;;  %v819_v63 = vmul.f32 %v1423_v10, %v803_v53  ;;  %v855_v29 = vmul.f32 %v823_v43, %v1762_v57  ;;  %v862_v24 = vsub.f32 %v830_v28, %v846_v6  ;;  %v841_v57 = vld [vmem:[%s2081_s2 + $0x34] sm:$0xf] }
 0x101   : > { %v1425_v17 = vpop.eup %1424  ;;  %v850_v13 = vmul.f32 %v1882_v52, %v1738_v36  ;;  %v836_v36 = vld [vmem:[%s2081_s2 + $0x20] sm:$0xf] }
 0x102   : > { %v825_v1 = vmul.f32 %v1425_v17, %v809_v19  ;;  %v1427_v32 = vpop.eup %1426  ;;  %v851_v41 = vmul.f32 %v819_v63, %v1736_v0  ;;  %v837_v0 = vld [vmem:[%s2081_s2 + $0x24] sm:$0xf]  ;;  %v871_v55 = vsub.f32 %v839_v49, %v855_v29 }
 0x103   : > { %902 = vperm.xlu1 %1387, %v1882_v52   ;;  %v820_v8 = vmul.f32 %v1427_v32, %v804_v26  ;;  %v869_v62 = vsub.f32 %v837_v0, %v853_v5  ;;  %v866_v16 = vsub.f32 %v834_v15, %v850_v13 }
 0x104   : > { %930 = vperm.xlu0 %1386, %v825_v1   ;;  %v867_v4 = vsub.f32 %v835_v56, %v851_v41  ;;  %v857_v20 = vmul.f32 %v825_v1, %v1788_v44  ;;  %v843_v44 = vld [vmem:[%s2081_s2 + $0x3c] sm:$0xf] }
 0x105   : > { %v852_v19 = vmul.f32 %v820_v8, %v1752_v50  ;;  %v840_v50 = vld [vmem:[%s2081_s2 + $0x30] sm:$0xf] }
 0x106   : > { %v1429_v40 = vpop.eup %1428  ;;  %v873_v61 = vsub.f32 %v841_v57, %v857_v20 }
 0x107   : > { %906 = vperm.xlu1 %1387, %v819_v63   ;;  %v827_v34 = vmul.f32 %v1429_v40, %v811_v31  ;;  %v1431_v39 = vpop.eup %1430  ;;  %v868_v7 = vsub.f32 %v836_v36, %v852_v19 }
 0x108   : > { %v822_v3 = vmul.f32 %v1431_v39, %v806_v2  ;;  %v1433_v23 = vpop.eup %1432  ;;  %v943_v39 = vlaneseq }
 0x109   : > { %938 = vperm.xlu0 %1386, %v827_v34   ;;  %v824_v33 = vmul.f32 %v1433_v23, %v808_v48  ;;  %v1435_v51 = vpop.eup %1434  ;;  %v859_v43 = vmul.f32 %v827_v34, %v1804_v12  ;;  %v838_v12 = vld [vmem:[%s2081_s2 + $0x28] sm:$0xf] }
 0x10a   : > { %v826_v14 = vmul.f32 %v1435_v51, %v810_v25  ;;  %v854_v52 = vmul.f32 %v822_v3, %v1764_v58  ;;  %v842_v58 = vld [vmem:[%s2081_s2 + $0x38] sm:$0xf]  ;;  %v944_v46 = vshrl.u32 %v943_v39, 7  ;;  %v1436_v51 = vld [vmem:[%s1498_s17 + $0x8] sm:$0xff] }
 0x10b   : > { %910 = vperm.xlu1 %1387, %v820_v8   ;;  %v875_v10 = vsub.f32 %v843_v44, %v859_v43  ;;  %v856_v53 = vmul.f32 %v824_v33, %v1794_v30  ;;  %v941_v8 = vunpack.c.l.s4 %v1461_v35  ;;  %v1440_v43 = vld [vmem:[%s1498_s17] sm:$0xff] }
 0x10c   : > { %v870_v17 = vsub.f32 %v838_v12, %v854_v52  ;;  %v858_v31 = vmul.f32 %v826_v14, %v1852_v45 }
 0x10d   : > { %1090 = vperm.xlu0 %1386, %v861_v21   ;;  %v872_v1 = vsub.f32 %v840_v50, %v856_v53  ;;  %v942_v21 = vunpack.c.0.s8 %v941_v8 }
 0x10e   : > { %v874_v32 = vsub.f32 %v842_v58, %v858_v31 }
 0x10f   : > { %918 = vperm.xlu1 %1387, %v822_v3   ;;  %v1983_v23 = vsub.s32 %v942_v21, %v944_v46 }
 0x111   : > { %1098 = vperm.xlu0 %1386, %v863_v42  }
 0x113   : > { %926 = vperm.xlu1 %1387, %v824_v33  }
 0x115   : > { %1106 = vperm.xlu0 %1386, %v865_v18  }
 0x117   : > { %934 = vperm.xlu1 %1387, %v826_v14  }
 0x119   : > { %1114 = vperm.xlu0 %1386, %v867_v4  }
 0x11b   : > { %1086 = vperm.xlu1 %1387, %v860_v38  }
 0x11d   : > { %1122 = vperm.xlu0 %1386, %v869_v62   ;;  %v1438_v62 = vld [vmem:[%s1498_s17 + $0x28] sm:$0xff] }
 0x11f   : > { %1094 = vperm.xlu1 %1387, %v862_v24  }
 0x121   : > { %1130 = vperm.xlu0 %1386, %v871_v55  }
 0x123   : > { %1102 = vperm.xlu1 %1387, %v864_v11   ;;  %v1439_v11 = vld [vmem:[%s1498_s17 + $0x38] sm:$0xff] }
 0x125   : > { %1138 = vperm.xlu0 %1386, %v873_v61  }
 0x127   : > { %1110 = vperm.xlu1 %1387, %v866_v16  }
 0x129   : > { %1146 = vperm.xlu0 %1386, %v875_v10  }
 0x12b   : > { %1118 = vperm.xlu1 %1387, %v868_v7   ;;  %v1441_v7 = vld [vmem:[%s1498_s17 + $0x48] sm:$0xff] }
 0x12f   : > { %1126 = vperm.xlu1 %1387, %v870_v17  }
 0x133   : > { %1134 = vperm.xlu1 %1387, %v872_v1   ;;  %v1442_v1 = vld [vmem:[%s1498_s17 + $0x10] sm:$0xff] }
 0x137   : > { %1142 = vperm.xlu1 %1387, %v874_v32  }
 0x16a   : > { %v883_v63 = vpop.permute.xlu1 %882 }
 0x16b   : > { %v879_v26 = vpop.permute.xlu0 %878  ;;  %v953_v54 = vrot.slane %v883_v63, %v1983_v23 }
 0x16c   : > { %v946_v27 = vrot.slane %v879_v26, %v1983_v23  ;;  %v1443_v26 = vld [vmem:[%s1498_s17 + $0x58] sm:$0xff] }
 0x16d   : > { %v1069_v25 = vmul.f32 %v1436_v51, %v953_v54 }
 0x16e   : > { %v1973_v40 = vpop.permute.xlu1 %886  ;;  %v1068_v44 = vmul.f32 %v1440_v43, %v946_v27 }
 0x16f   : > { %v960_v16 = vrot.slane %v1973_v40, %v1983_v23 }
 0x171   : > { %v1070_v31 = vmul.f32 %v1442_v1, %v960_v16 }
 0x172   : > { %v891_v30 = vpop.permute.xlu1 %890 }
 0x173   : > { %v967_v18 = vrot.slane %v891_v30, %v1983_v23 }
 0x175   : > { %v1071_v4 = vmul.f32 %v1437_v60, %v967_v18 }
 0x176   : > { %v1975_v34 = vpop.permute.xlu1 %894  ;;  %v915_v37 = vpop.permute.xlu0 %914 }
 0x177   : > { %v1009_v57 = vrot.slane %v915_v37, %v1983_v23  ;;  %v974_v58 = vrot.slane %v1975_v34, %v1983_v23 }
 0x179   : > { %v1077_v52 = vmul.f32 %v1441_v7, %v1009_v57 }
 0x17a   : > { %v899_v45 = vpop.permute.xlu1 %898 }
 0x17b   : > { %v1977_v2 = vpop.permute.xlu0 %922  ;;  %v981_v5 = vrot.slane %v899_v45, %v1983_v23  ;;  %v1444_v45 = vld [vmem:[%s1498_s17 + $0x20] sm:$0xff] }
 0x17c   : > { %v1023_v12 = vrot.slane %v1977_v2, %v1983_v23  ;;  %v1072_v34 = vmul.f32 %v1444_v45, %v974_v58 }
 0x17d   : > { %v1073_v29 = vmul.f32 %v1438_v62, %v981_v5  ;;  %v1448_v62 = vld [vmem:[%s1498_s17 + $0x40] sm:$0xff] }
 0x17e   : > { %v1979_v47 = vpop.permute.xlu1 %902  ;;  %v1079_v30 = vmul.f32 %v1443_v26, %v1023_v12 }
 0x17f   : > { %v1981_v3 = vpop.permute.xlu0 %930  ;;  %v988_v2 = vrot.slane %v1979_v47, %v1983_v23 }
 0x180   : > { %v1037_v37 = vrot.slane %v1981_v3, %v1983_v23  ;;  %v1445_v3 = vld [vmem:[%s1498_s17 + $0x68] sm:$0xff] }
 0x182   : > { %v907_v48 = vpop.permute.xlu1 %906  ;;  %v1081_v54 = vmul.f32 %v1445_v3, %v1037_v37 }
 0x183   : > { %v995_v49 = vrot.slane %v907_v48, %v1983_v23 }
 0x184   : > { %v1985_v42 = vpop.permute.xlu0 %938 }
 0x185   : > { %v1075_v13 = vmul.f32 %v1439_v11, %v995_v49 }
 0x186   : > { %v1988_v22 = vpop.permute.xlu1 %910 }
 0x188   : > { %v1091_v33 = vpop.permute.xlu0 %1090 }
 0x189   : > { %v1161_v41 = vrot.slane %v1091_v33, %v1983_v23  ;;  %v1051_v33 = vrot.slane %v1985_v42, %v1983_v23  ;;  %v1447_v42 = vld [vmem:[%s1498_s17 + $0x78] sm:$0xff] }
 0x18a   : > { %v1993_v56 = vpop.permute.xlu1 %918 }
 0x18b   : > { %v1277_v14 = vadd.f32 %v1161_v41, %v1069_v25  ;;  %v1446_v41 = vld [vmem:[%s1498_s17 + $0x30] sm:$0xff]  ;;  %v1083_v5 = vmul.f32 %v1447_v42, %v1051_v33 }
 0x18c   : > { %v1099_v59 = vpop.permute.xlu0 %1098  ;;  %v1074_v47 = vmul.f32 %v1446_v41, %v988_v2 }
 0x18d   : > { %1293 = vst [vmem:[%s2000_s11 + $0x8] sm:$0xff] %v1277_v14  ;;  %v1175_v0 = vrot.slane %v1099_v59, %v1983_v23  ;;  %v1002_v14 = vrot.slane %v1988_v22, %v1983_v23  ;;  %v1016_v22 = vrot.slane %v1993_v56, %v1983_v23 }
 0x18e   : > { %v2006_v38 = vpop.permute.xlu1 %926 }
 0x18f   : > { %v1279_v6 = vadd.f32 %v1175_v0, %v1071_v4  ;;  %v1030_v11 = vrot.slane %v2006_v38, %v1983_v23 }
 0x190   : > { %v1107_v28 = vpop.permute.xlu0 %1106 }
 0x191   : > { %1295 = vst [vmem:[%s2000_s11 + $0x18] sm:$0xff] %v1279_v6  ;;  %v1189_v24 = vrot.slane %v1107_v28, %v1983_v23 }
 0x192   : > { %v2012_v9 = vpop.permute.xlu1 %934 }
 0x193   : > { %v1281_v55 = vadd.f32 %v1189_v24, %v1073_v29  ;;  %v1076_v29 = vmul.f32 %v1448_v62, %v1002_v14 }
 0x194   : > { %v1115_v20 = vpop.permute.xlu0 %1114 }
 0x195   : > { %1297 = vst [vmem:[%s2000_s11 + $0x28] sm:$0xff] %v1281_v55  ;;  %v1203_v15 = vrot.slane %v1115_v20, %v1983_v23  ;;  %v1449_v20 = vld [vmem:[%s1498_s17 + $0x50] sm:$0xff] }
 0x196   : > { %v1087_v61 = vpop.permute.xlu1 %1086  ;;  %v1078_v57 = vmul.f32 %v1449_v20, %v1016_v22 }
 0x197   : > { %v1154_v19 = vrot.slane %v1087_v61, %v1983_v23  ;;  %v1283_v36 = vadd.f32 %v1203_v15, %v1075_v13  ;;  %v1450_v61 = vld [vmem:[%s1498_s17 + $0x60] sm:$0xff] }
 0x198   : > { %v1123_v10 = vpop.permute.xlu0 %1122  ;;  %v1080_v43 = vmul.f32 %v1450_v61, %v1030_v11 }
 0x199   : > { %v1276_v17 = vadd.f32 %v1154_v19, %v1068_v44  ;;  %1299 = vst [vmem:[%s2000_s11 + $0x38] sm:$0xff] %v1283_v36  ;;  %v1217_v53 = vrot.slane %v1123_v10, %v1983_v23  ;;  %v1044_v44 = vrot.slane %v2012_v9, %v1983_v23  ;;  %v1451_v10 = vld [vmem:[%s1498_s17 + $0x70] sm:$0xff] }
 0x19a   : > { %v1095_v50 = vpop.permute.xlu1 %1094 }
 0x19b   : > { %1292 = vst [vmem:[%s2000_s11] sm:$0xff] %v1276_v17  ;;  %v1168_v32 = vrot.slane %v1095_v50, %v1983_v23  ;;  %v1285_v63 = vadd.f32 %v1217_v53, %v1077_v52  ;;  %v1082_v7 = vmul.f32 %v1451_v10, %v1044_v44 }
 0x19c   : > { %v1131_v40 = vpop.permute.xlu0 %1130 }
 0x19d   : > { %v1278_v35 = vadd.f32 %v1168_v32, %v1070_v31  ;;  %1301 = vst [vmem:[%s2000_s11 + $0x48] sm:$0xff] %v1285_v63  ;;  %v1231_v8 = vrot.slane %v1131_v40, %v1983_v23 }
 0x19e   : > { %v1103_v39 = vpop.permute.xlu1 %1102 }
 0x19f   : > { %1294 = vst [vmem:[%s2000_s11 + $0x10] sm:$0xff] %v1278_v35  ;;  %v1182_v21 = vrot.slane %v1103_v39, %v1983_v23  ;;  %v1287_v46 = vadd.f32 %v1231_v8, %v1079_v30 }
 0x1a0   : > { %v1139_v48 = vpop.permute.xlu0 %1138 }
 0x1a1   : > { %v1280_v51 = vadd.f32 %v1182_v21, %v1072_v34  ;;  %1303 = vst [vmem:[%s2000_s11 + $0x58] sm:$0xff] %v1287_v46  ;;  %v1245_v25 = vrot.slane %v1139_v48, %v1983_v23 }
 0x1a2   : > { %v1111_v18 = vpop.permute.xlu1 %1110 }
 0x1a3   : > { %1296 = vst [vmem:[%s2000_s11 + $0x20] sm:$0xff] %v1280_v51  ;;  %v1196_v59 = vrot.slane %v1111_v18, %v1983_v23  ;;  %v1289_v60 = vadd.f32 %v1245_v25, %v1081_v54 }
 0x1a4   : > { %v1147_v4 = vpop.permute.xlu0 %1146 }
 0x1a5   : > { %v1282_v0 = vadd.f32 %v1196_v59, %v1074_v47  ;;  %1305 = vst [vmem:[%s2000_s11 + $0x68] sm:$0xff] %v1289_v60  ;;  %v1259_v6 = vrot.slane %v1147_v4, %v1983_v23 }
 0x1a6   : > { %v1119_v28 = vpop.permute.xlu1 %1118 }
 0x1a7   : > { %1298 = vst [vmem:[%s2000_s11 + $0x30] sm:$0xff] %v1282_v0  ;;  %v1210_v49 = vrot.slane %v1119_v28, %v1983_v23  ;;  %v1291_v24 = vadd.f32 %v1259_v6, %v1083_v5 }
 0x1a9   : > { %v1284_v27 = vadd.f32 %v1210_v49, %v1076_v29  ;;  %1307 = vst [vmem:[%s2000_s11 + $0x78] sm:$0xff] %v1291_v24 }
 0x1aa   : > { %v1127_v55 = vpop.permute.xlu1 %1126 }
 0x1ab   : > { %1300 = vst [vmem:[%s2000_s11 + $0x40] sm:$0xff] %v1284_v27  ;;  %v1224_v13 = vrot.slane %v1127_v55, %v1983_v23 }
 0x1ad   : > { %v1286_v56 = vadd.f32 %v1224_v13, %v1078_v57 }
 0x1ae   : > { %v1135_v15 = vpop.permute.xlu1 %1134 }
 0x1af   : > { %1302 = vst [vmem:[%s2000_s11 + $0x50] sm:$0xff] %v1286_v56  ;;  %v1238_v16 = vrot.slane %v1135_v15, %v1983_v23 }
 0x1b1   : > { %v1288_v19 = vadd.f32 %v1238_v16, %v1080_v43 }
 0x1b2   : > { %v1143_v36 = vpop.permute.xlu1 %1142 }
 0x1b3   : > { %1304 = vst [vmem:[%s2000_s11 + $0x60] sm:$0xff] %v1288_v19  ;;  %v1252_v38 = vrot.slane %v1143_v36, %v1983_v23 }
 0x1b5   : > { %v1290_v52 = vadd.f32 %v1252_v38, %v1082_v7 }
 0x1b7   : > { %1306 = vst [vmem:[%s2000_s11 + $0x70] sm:$0xff] %v1290_v52 }
 0x1b8 PF: > { %s13_s12 = sadd.s32 1, %s1458_s12  }
 0x1b9   : > { %p10_p4 = scmp.ge.s32.totalorder %s13_s12, 4  }
 0x1bb   :  { %12 = sbr.rel (!%p10_p4) target bundleno = 1 (0x1), region = 62 }

</bundles_post_ra>
